<compile_context>
chip_gen: v5e
topology: v5e:2x2
jax: 0.10.0
libtpu: 0.0.40
codegen_flags: <defaults>
</compile_context>

<pallas_src>
import functools

import jax
import jax.numpy as jnp
from jax.experimental import pallas as pl
from jax.experimental.pallas import tpu as pltpu

LANE = 128      # TPU lane width (last dim of a vreg)
SUBLANE = 8     # TPU sublane width (second-to-last dim of a vreg)


def _round_up(n, m):
    return ((n + m - 1) // m) * m


def _vae_fwd_kernel(
    x_ref, eps_ref,
    w11_ref, b11_ref,
    whead_ref, bhead_ref,     # fused [H_pad, 2*L_pad] = Wmu | Wls
    w21_ref, b21_ref,
    w22_ref, b22_ref,
    out_ref,                  # [tb, Dp + enc_lanes] = y | (z,mu,log_std)
    *, latent_p, latent_real, out_dim_p, pack_latents,
):
    cdt = w11_ref.dtype   # compute dtype of the MXU operands (f32 or bf16)

    x = x_ref[...]

    # ----- encoder -----
    h1 = jnp.tanh(
        jnp.dot(x, w11_ref[...], preferred_element_type=jnp.float32)
        + b11_ref[...]
    )
    # fused mu|log_std head: one MXU pass instead of two
    head = (
        jnp.dot(h1.astype(cdt), whead_ref[...], preferred_element_type=jnp.float32)
        + bhead_ref[...]
    )
    mu = head[:, :latent_p]           # 128-aligned static slices
    log_std = head[:, latent_p:]

    # ----- reparameterization: z = mu + exp(log_std) * eps -----
    z = mu + jnp.exp(log_std) * eps_ref[...]

    # ----- bernoulli decoder -----
    h2 = jnp.tanh(
        jnp.dot(z.astype(cdt), w21_ref[...], preferred_element_type=jnp.float32)
        + b21_ref[...]
    )
    logits = (
        jnp.dot(h2.astype(cdt), w22_ref[...], preferred_element_type=jnp.float32)
        + b22_ref[...]
    )
    y = jax.nn.sigmoid(logits)

    # ----- single merged output slab, no in-kernel concatenate -----
    out_ref[:, :out_dim_p] = y.astype(out_ref.dtype)
    base = out_dim_p
    if pack_latents:
        # z|mu|log_std packed into one 128-lane region: store z dense (its
        # padded lanes are exactly zero), then overwrite the mu / log_std
        # sub-ranges.  Writeback DMA stays full-width and lane-dense.
        out_ref[:, base:base + latent_p] = z.astype(out_ref.dtype)
        out_ref[:, base + latent_real:base + 2 * latent_real] = (
            mu[:, :latent_real].astype(out_ref.dtype))
        out_ref[:, base + 2 * latent_real:base + 3 * latent_real] = (
            log_std[:, :latent_real].astype(out_ref.dtype))
    else:
        out_ref[:, base:base + latent_p] = z.astype(out_ref.dtype)
        out_ref[:, base + latent_p:base + 2 * latent_p] = mu.astype(out_ref.dtype)
        out_ref[:, base + 2 * latent_p:base + 3 * latent_p] = (
            log_std.astype(out_ref.dtype))


def prepare_params(params, *, compute_dtype=jnp.float32):
    """Pad + fuse the weights ONCE (outside the hot path).

    compute_dtype: jnp.float32 (default, exact) or jnp.bfloat16 (v6e/v7x MXU
    fast path; biases and accumulation stay f32).
    """
    (w11, b11, wmu, bmu, wls, bls, w21, b21, w22, b22) = params
    D, H = w11.shape
    L = wmu.shape[1]
    Dp, Hp, Lp = _round_up(D, LANE), _round_up(H, LANE), _round_up(L, LANE)

    def pad2(a, rows, cols, dtype):
        a = a.astype(dtype)
        return jnp.pad(a, ((0, rows - a.shape[0]), (0, cols - a.shape[1])))

    f32 = jnp.float32
    return dict(
        dims=(D, H, L, Dp, Hp, Lp),
        compute_dtype=compute_dtype,
        w11=pad2(w11, Dp, Hp, compute_dtype),
        b11=pad2(b11, 1, Hp, f32),
        whead=jnp.concatenate(
            [pad2(wmu, Hp, Lp, compute_dtype), pad2(wls, Hp, Lp, compute_dtype)],
            axis=1),
        bhead=jnp.concatenate([pad2(bmu, 1, Lp, f32), pad2(bls, 1, Lp, f32)], axis=1),
        w21=pad2(w21, Lp, Hp, compute_dtype),
        b21=pad2(b21, 1, Hp, f32),
        w22=pad2(w22, Hp, Dp, compute_dtype),
        b22=pad2(b22, 1, Dp, f32),
    )


def vae_forward(x, eps, prepared, *, max_tile_b=1024):
    """x: [B, input_Dim], eps: [B, latent_Dim]. Returns (y, z_tilde, mu, log_std)."""
    B, D_in = x.shape
    D, H, L, Dp, Hp, Lp = prepared["dims"]
    assert D_in == D and eps.shape == (B, L)
    cdt = prepared["compute_dtype"]

    # enc layout: pack z|mu|log_std into one 128-lane region when they fit
    pack = (3 * L) <= Lp
    enc_lanes = Lp if pack else 3 * Lp
    out_lanes = Dp + enc_lanes

    # ---- batch tiling ----
    b_sub = _round_up(B, SUBLANE)
    if b_sub > max_tile_b:
        tb = max_tile_b
    elif b_sub >= 512:
        # batch fits one tile but is big: split so the grid has >=2 parallel
        # steps (keeps v7x's second TensorCore busy; harmless on v5e/v6e).
        tb = _round_up(pl.cdiv(b_sub, 2), SUBLANE)
    else:
        tb = b_sub
    Bp = _round_up(B, tb)
    grid = (Bp // tb,)

    # per-call padding: only the activations (weights were padded once)
    x_p = jnp.pad(x.astype(cdt), ((0, Bp - B), (0, Dp - D)))
    eps_p = jnp.pad(eps.astype(jnp.float32), ((0, Bp - B), (0, Lp - L)))

    # activations / outputs tile over the batch; weights are VMEM-resident
    x_spec = pl.BlockSpec((tb, Dp), lambda i: (i, 0))
    eps_spec = pl.BlockSpec((tb, Lp), lambda i: (i, 0))

    def w_spec(shape):
        return pl.BlockSpec(shape, lambda i: (0, 0))

    out_shape = jax.ShapeDtypeStruct((Bp, out_lanes), jnp.float32)
    out_spec = pl.BlockSpec((tb, out_lanes), lambda i: (i, 0))

    # advisory cost estimate so XLA can schedule neighbours around the call
    def nbytes(a):
        return a.size * a.dtype.itemsize

    weights = [prepared[k] for k in
               ("w11", "b11", "whead", "bhead", "w21", "b21", "w22", "b22")]
    flops = 2 * Bp * (Dp * Hp + Hp * 2 * Lp + Lp * Hp + Hp * Dp)
    transcendentals = Bp * (Hp + Lp + Hp + Dp)  # tanh, exp, tanh, sigmoid
    bytes_accessed = (nbytes(x_p) + nbytes(eps_p) + Bp * out_lanes * 4
                      + sum(nbytes(w) for w in weights))

    fn = pl.pallas_call(
        functools.partial(
            _vae_fwd_kernel,
            latent_p=Lp, latent_real=L, out_dim_p=Dp, pack_latents=pack,
        ),
        out_shape=out_shape,
        grid=grid,
        in_specs=[
            x_spec, eps_spec,
            w_spec((Dp, Hp)), w_spec((1, Hp)),
            w_spec((Hp, 2 * Lp)), w_spec((1, 2 * Lp)),
            w_spec((Lp, Hp)), w_spec((1, Hp)),
            w_spec((Hp, Dp)), w_spec((1, Dp)),
        ],
        out_specs=out_spec,
        compiler_params=pltpu.CompilerParams(
            dimension_semantics=("parallel",),   # batch tiles are independent
        ),
        cost_estimate=pl.CostEstimate(
            flops=flops,
            transcendentals=transcendentals,
            bytes_accessed=bytes_accessed,
        ),
    )
    out = fn(x_p, eps_p, *weights)

    # slice the real (unpadded) values back out of the lane-dense slab
    y = out[:B, :D]
    if pack:
        z = out[:B, Dp:Dp + L]
        mu = out[:B, Dp + L:Dp + 2 * L]
        log_std = out[:B, Dp + 2 * L:Dp + 3 * L]
    else:
        z = out[:B, Dp:Dp + L]
        mu = out[:B, Dp + Lp:Dp + Lp + L]
        log_std = out[:B, Dp + 2 * Lp:Dp + 2 * Lp + L]
    return y, z, mu, log_std


def init_params(key, input_dim, hidden_unit, latent_dim):
    """Deterministic synthetic params (PyTorch-Linear-style uniform init).

    Weights are [in_features, out_features] (transposed vs. nn.Linear) so the
    kernel computes x @ W + b; biases are [1, out_features].
    """
    def linear(k, fan_in, fan_out):
        k1, k2 = jax.random.split(k)
        bound = 1.0 / jnp.sqrt(fan_in)
        w = jax.random.uniform(k1, (fan_in, fan_out), jnp.float32, -bound, bound)
        b = jax.random.uniform(k2, (1, fan_out), jnp.float32, -bound, bound)
        return w, b

    keys = jax.random.split(key, 5)
    w11, b11 = linear(keys[0], input_dim, hidden_unit)
    wmu, bmu = linear(keys[1], hidden_unit, latent_dim)
    wls, bls = linear(keys[2], hidden_unit, latent_dim)
    w21, b21 = linear(keys[3], latent_dim, hidden_unit)
    w22, b22 = linear(keys[4], hidden_unit, input_dim)
    return (w11, b11, wmu, bmu, wls, bls, w21, b21, w22, b22)


def vae_forward_ref(x, eps, params):
    """Pure-JAX reference for correctness check."""
    (w11, b11, wmu, bmu, wls, bls, w21, b21, w22, b22) = params
    h1 = jnp.tanh(x @ w11 + b11)
    mu = h1 @ wmu + bmu
    log_std = h1 @ wls + bls
    z = mu + jnp.exp(log_std) * eps
    h2 = jnp.tanh(z @ w21 + b21)
    y = jax.nn.sigmoid(h2 @ w22 + b22)
    return y, z, mu, log_std


if __name__ == "__main__":
    # TODO(synk): torch's in-module FloatTensor.normal_() RNG has no JAX/Pallas
    # equivalent; eps ~ N(0,1) is generated outside and passed in explicitly.
    input_Dim, hidden_unit, latent_Dim = 64, 32, 16
    batch = 8

    root = jax.random.PRNGKey(0)
    k_x, k_eps, k_params = jax.random.split(root, 3)

    x = jax.random.uniform(k_x, (batch, input_Dim), jnp.float32)       # data in [0,1]
    eps = jax.random.normal(k_eps, (batch, latent_Dim), jnp.float32)   # N(0,1) noise
    params = init_params(k_params, input_Dim, hidden_unit, latent_Dim)

    # pad/fuse weights once; per-call only x/eps are padded.
    # (on v6e/v7x pass compute_dtype=jnp.bfloat16 and loosen tolerance to ~1e-2)
    prepared = prepare_params(params, compute_dtype=jnp.float32)
    fwd = jax.jit(lambda xx, ee: vae_forward(xx, ee, prepared))

    y, z_tilde, mu, log_std = jax.block_until_ready(fwd(x, eps))

    # correctness check vs pure-JAX reference
    y_r, z_r, mu_r, ls_r = vae_forward_ref(x, eps, params)
    for got, ref in ((y, y_r), (z_tilde, z_r), (mu, mu_r), (log_std, ls_r)):
        assert got.shape == ref.shape
        assert jnp.allclose(got, ref, atol=1e-5, rtol=1e-5)

    print("KERNEL_OK")
</pallas_src>

<mosaic_0001>
module attributes {stable_mosaic.version = 11 : i64} {
  func.func @_vae_fwd_kernel(%arg0: i32, %arg1: memref<8x128xf32, #tpu.memory_space<vmem>>, %arg2: memref<8x128xf32, #tpu.memory_space<vmem>>, %arg3: memref<128x128xf32, #tpu.memory_space<vmem>>, %arg4: memref<1x128xf32, #tpu.memory_space<vmem>>, %arg5: memref<128x256xf32, #tpu.memory_space<vmem>>, %arg6: memref<1x256xf32, #tpu.memory_space<vmem>>, %arg7: memref<128x128xf32, #tpu.memory_space<vmem>>, %arg8: memref<1x128xf32, #tpu.memory_space<vmem>>, %arg9: memref<128x128xf32, #tpu.memory_space<vmem>>, %arg10: memref<1x128xf32, #tpu.memory_space<vmem>>, %arg11: memref<8x256xf32, #tpu.memory_space<vmem>>) attributes {dimension_semantics = [#tpu.dimension_semantics<parallel>], iteration_bounds = array<i64: 1>, scalar_prefetch = 0 : i64, scratch_operands = 0 : i64, tpu.core_type = #tpu.core_type<tc>, window_params = [{transform_indices = @transform_0, window_bounds = array<i64: 8, 128>}, {transform_indices = @transform_1, window_bounds = array<i64: 8, 128>}, {pipeline_mode = #tpu.pipeline_mode<synchronous>, transform_indices = @transform_2, window_bounds = array<i64: 128, 128>}, {pipeline_mode = #tpu.pipeline_mode<synchronous>, transform_indices = @transform_3, window_bounds = array<i64: 1, 128>}, {pipeline_mode = #tpu.pipeline_mode<synchronous>, transform_indices = @transform_4, window_bounds = array<i64: 128, 256>}, {pipeline_mode = #tpu.pipeline_mode<synchronous>, transform_indices = @transform_5, window_bounds = array<i64: 1, 256>}, {pipeline_mode = #tpu.pipeline_mode<synchronous>, transform_indices = @transform_6, window_bounds = array<i64: 128, 128>}, {pipeline_mode = #tpu.pipeline_mode<synchronous>, transform_indices = @transform_7, window_bounds = array<i64: 1, 128>}, {pipeline_mode = #tpu.pipeline_mode<synchronous>, transform_indices = @transform_8, window_bounds = array<i64: 128, 128>}, {pipeline_mode = #tpu.pipeline_mode<synchronous>, transform_indices = @transform_9, window_bounds = array<i64: 1, 128>}, {transform_indices = @transform_10, window_bounds = array<i64: 8, 256>}]} {
    %c0 = arith.constant 0 : index
    %c0_0 = arith.constant 0 : index
    %0 = vector.load %arg1[%c0, %c0_0] : memref<8x128xf32, #tpu.memory_space<vmem>>, vector<8x128xf32>
    %c0_1 = arith.constant 0 : index
    %c0_2 = arith.constant 0 : index
    %1 = vector.load %arg3[%c0_1, %c0_2] : memref<128x128xf32, #tpu.memory_space<vmem>>, vector<128x128xf32>
    %cst = arith.constant dense<0.000000e+00> : vector<8x128xf32>
    %2 = tpu.matmul %0, %1, %cst {dimension_numbers = #tpu.dot_dimension_numbers<[1], [0], [0], [1], [0, 0, 1, 1], [], []>} : vector<8x128xf32>, vector<128x128xf32>, vector<8x128xf32> -> vector<8x128xf32>
    %c0_3 = arith.constant 0 : index
    %c0_4 = arith.constant 0 : index
    %3 = vector.load %arg4[%c0_3, %c0_4] : memref<1x128xf32, #tpu.memory_space<vmem>>, vector<1x128xf32>
    %4 = vector.broadcast %3 : vector<1x128xf32> to vector<8x128xf32>
    %5 = arith.addf %2, %4 : vector<8x128xf32>
    %6 = math.tanh %5 : vector<8x128xf32>
    %c0_5 = arith.constant 0 : index
    %c0_6 = arith.constant 0 : index
    %7 = vector.load %arg5[%c0_5, %c0_6] : memref<128x256xf32, #tpu.memory_space<vmem>>, vector<128x256xf32>
    %cst_7 = arith.constant dense<0.000000e+00> : vector<8x256xf32>
    %8 = tpu.matmul %6, %7, %cst_7 {dimension_numbers = #tpu.dot_dimension_numbers<[1], [0], [0], [1], [0, 0, 1, 1], [], []>} : vector<8x128xf32>, vector<128x256xf32>, vector<8x256xf32> -> vector<8x256xf32>
    %c0_8 = arith.constant 0 : index
    %c0_9 = arith.constant 0 : index
    %9 = vector.load %arg6[%c0_8, %c0_9] : memref<1x256xf32, #tpu.memory_space<vmem>>, vector<1x256xf32>
    %10 = vector.broadcast %9 : vector<1x256xf32> to vector<8x256xf32>
    %11 = arith.addf %8, %10 : vector<8x256xf32>
    %12 = vector.extract_strided_slice %11 {offsets = [0, 0], sizes = [8, 128], strides = [1, 1]} : vector<8x256xf32> to vector<8x128xf32>
    %13 = vector.extract_strided_slice %11 {offsets = [0, 128], sizes = [8, 128], strides = [1, 1]} : vector<8x256xf32> to vector<8x128xf32>
    %14 = math.exp %13 : vector<8x128xf32>
    %c0_10 = arith.constant 0 : index
    %c0_11 = arith.constant 0 : index
    %15 = vector.load %arg2[%c0_10, %c0_11] : memref<8x128xf32, #tpu.memory_space<vmem>>, vector<8x128xf32>
    %16 = arith.mulf %14, %15 : vector<8x128xf32>
    %17 = arith.addf %12, %16 : vector<8x128xf32>
    %c0_12 = arith.constant 0 : index
    %c0_13 = arith.constant 0 : index
    %18 = vector.load %arg7[%c0_12, %c0_13] : memref<128x128xf32, #tpu.memory_space<vmem>>, vector<128x128xf32>
    %cst_14 = arith.constant dense<0.000000e+00> : vector<8x128xf32>
    %19 = tpu.matmul %17, %18, %cst_14 {dimension_numbers = #tpu.dot_dimension_numbers<[1], [0], [0], [1], [0, 0, 1, 1], [], []>} : vector<8x128xf32>, vector<128x128xf32>, vector<8x128xf32> -> vector<8x128xf32>
    %c0_15 = arith.constant 0 : index
    %c0_16 = arith.constant 0 : index
    %20 = vector.load %arg8[%c0_15, %c0_16] : memref<1x128xf32, #tpu.memory_space<vmem>>, vector<1x128xf32>
    %21 = vector.broadcast %20 : vector<1x128xf32> to vector<8x128xf32>
    %22 = arith.addf %19, %21 : vector<8x128xf32>
    %23 = math.tanh %22 : vector<8x128xf32>
    %c0_17 = arith.constant 0 : index
    %c0_18 = arith.constant 0 : index
    %24 = vector.load %arg9[%c0_17, %c0_18] : memref<128x128xf32, #tpu.memory_space<vmem>>, vector<128x128xf32>
    %cst_19 = arith.constant dense<0.000000e+00> : vector<8x128xf32>
    %25 = tpu.matmul %23, %24, %cst_19 {dimension_numbers = #tpu.dot_dimension_numbers<[1], [0], [0], [1], [0, 0, 1, 1], [], []>} : vector<8x128xf32>, vector<128x128xf32>, vector<8x128xf32> -> vector<8x128xf32>
    %c0_20 = arith.constant 0 : index
    %c0_21 = arith.constant 0 : index
    %26 = vector.load %arg10[%c0_20, %c0_21] : memref<1x128xf32, #tpu.memory_space<vmem>>, vector<1x128xf32>
    %27 = vector.broadcast %26 : vector<1x128xf32> to vector<8x128xf32>
    %28 = arith.addf %25, %27 : vector<8x128xf32>
    %29 = arith.negf %28 : vector<8x128xf32>
    %30 = math.exp %29 : vector<8x128xf32>
    %cst_22 = arith.constant 1.000000e+00 : f32
    %31 = vector.broadcast %cst_22 : f32 to vector<8x128xf32>
    %32 = arith.addf %31, %30 : vector<8x128xf32>
    %33 = arith.divf %31, %32 : vector<8x128xf32>
    %c0_23 = arith.constant 0 : index
    %c0_24 = arith.constant 0 : index
    %34 = vector.load %arg11[%c0_23, %c0_24] : memref<8x256xf32, #tpu.memory_space<vmem>>, vector<8x128xf32>
    tpu.vector_store %arg11[%c0_23, %c0_24], %33 {strides = array<i32>} : memref<8x256xf32, #tpu.memory_space<vmem>>, vector<8x128xf32>,
    %c0_25 = arith.constant 0 : index
    %c128 = arith.constant 128 : index
    %35 = vector.load %arg11[%c0_25, %c128] : memref<8x256xf32, #tpu.memory_space<vmem>>, vector<8x128xf32>
    tpu.vector_store %arg11[%c0_25, %c128], %17 {strides = array<i32>} : memref<8x256xf32, #tpu.memory_space<vmem>>, vector<8x128xf32>,
    %36 = vector.extract_strided_slice %12 {offsets = [0, 0], sizes = [8, 16], strides = [1, 1]} : vector<8x128xf32> to vector<8x16xf32>
    %c0_26 = arith.constant 0 : index
    %c144 = arith.constant 144 : index
    %37 = vector.load %arg11[%c0_26, %c144] : memref<8x256xf32, #tpu.memory_space<vmem>>, vector<8x16xf32>
    tpu.vector_store %arg11[%c0_26, %c144], %36 {strides = array<i32>} : memref<8x256xf32, #tpu.memory_space<vmem>>, vector<8x16xf32>,
    %38 = vector.extract_strided_slice %13 {offsets = [0, 0], sizes = [8, 16], strides = [1, 1]} : vector<8x128xf32> to vector<8x16xf32>
    %c0_27 = arith.constant 0 : index
    %c160 = arith.constant 160 : index
    %39 = vector.load %arg11[%c0_27, %c160] : memref<8x256xf32, #tpu.memory_space<vmem>>, vector<8x16xf32>
    tpu.vector_store %arg11[%c0_27, %c160], %38 {strides = array<i32>} : memref<8x256xf32, #tpu.memory_space<vmem>>, vector<8x16xf32>,
    return
  }
  func.func @transform_0(%arg0: i32) -> (i32, i32) {
    %c0_i32 = arith.constant 0 : i32
    %c0_i32_0 = arith.constant 0 : i32
    return %arg0, %c0_i32 : i32, i32
  }
  func.func @transform_1(%arg0: i32) -> (i32, i32) {
    %c0_i32 = arith.constant 0 : i32
    %c0_i32_0 = arith.constant 0 : i32
    return %arg0, %c0_i32 : i32, i32
  }
  func.func @transform_2(%arg0: i32) -> (i32, i32) {
    %c0_i32 = arith.constant 0 : i32
    %c0_i32_0 = arith.constant 0 : i32
    %c0_i32_1 = arith.constant 0 : i32
    return %c0_i32, %c0_i32_0 : i32, i32
  }
  func.func @transform_3(%arg0: i32) -> (i32, i32) {
    %c0_i32 = arith.constant 0 : i32
    %c0_i32_0 = arith.constant 0 : i32
    %c0_i32_1 = arith.constant 0 : i32
    return %c0_i32, %c0_i32_0 : i32, i32
  }
  func.func @transform_4(%arg0: i32) -> (i32, i32) {
    %c0_i32 = arith.constant 0 : i32
    %c0_i32_0 = arith.constant 0 : i32
    %c0_i32_1 = arith.constant 0 : i32
    return %c0_i32, %c0_i32_0 : i32, i32
  }
  func.func @transform_5(%arg0: i32) -> (i32, i32) {
    %c0_i32 = arith.constant 0 : i32
    %c0_i32_0 = arith.constant 0 : i32
    %c0_i32_1 = arith.constant 0 : i32
    return %c0_i32, %c0_i32_0 : i32, i32
  }
  func.func @transform_6(%arg0: i32) -> (i32, i32) {
    %c0_i32 = arith.constant 0 : i32
    %c0_i32_0 = arith.constant 0 : i32
    %c0_i32_1 = arith.constant 0 : i32
    return %c0_i32, %c0_i32_0 : i32, i32
  }
  func.func @transform_7(%arg0: i32) -> (i32, i32) {
    %c0_i32 = arith.constant 0 : i32
    %c0_i32_0 = arith.constant 0 : i32
    %c0_i32_1 = arith.constant 0 : i32
    return %c0_i32, %c0_i32_0 : i32, i32
  }
  func.func @transform_8(%arg0: i32) -> (i32, i32) {
    %c0_i32 = arith.constant 0 : i32
    %c0_i32_0 = arith.constant 0 : i32
    %c0_i32_1 = arith.constant 0 : i32
    return %c0_i32, %c0_i32_0 : i32, i32
  }
  func.func @transform_9(%arg0: i32) -> (i32, i32) {
    %c0_i32 = arith.constant 0 : i32
    %c0_i32_0 = arith.constant 0 : i32
    %c0_i32_1 = arith.constant 0 : i32
    return %c0_i32, %c0_i32_0 : i32, i32
  }
  func.func @transform_10(%arg0: i32) -> (i32, i32) {
    %c0_i32 = arith.constant 0 : i32
    %c0_i32_0 = arith.constant 0 : i32
    return %arg0, %c0_i32 : i32, i32
  }
}

</mosaic_0001>

<bundles_post_ra>
// kernel: _lambda_.1
= control target key start
LH: loop header
LB: loop body
LE: loop exit
PB: predicated region body
PF: predicated region fallthrough
CT: control target
= control target key end

     0   :  { %15 = vsyncpa [#allocation3], 0  ;;  %s577_s0 = inlined_call_operand.vmem [shape: f32[8,128], index: 0, kind: input, shape index: {}]   ;;  %s578_s1 = inlined_call_operand.vmem [shape: f32[8,128], index: 1, kind: input, shape index: {}]   ;;  %s579_s2 = inlined_call_operand.hbm [shape: f32[128,128], index: 2, kind: input, shape index: {}]   ;;  %s580_s3 = inlined_call_operand.vmem [shape: f32[1,128], index: 3, kind: input, shape index: {}]   ;;  %s581_s4 = inlined_call_operand.hbm [shape: f32[128,256], index: 4, kind: input, shape index: {}]   ;;  %s582_s5 = inlined_call_operand.vmem [shape: f32[1,256], index: 5, kind: input, shape index: {}]   ;;  %s583_s6 = inlined_call_operand.hbm [shape: f32[128,128], index: 6, kind: input, shape index: {}]   ;;  %s584_s7 = inlined_call_operand.vmem [shape: f32[1,128], index: 7, kind: input, shape index: {}]   ;;  %s585_s8 = inlined_call_operand.hbm [shape: f32[128,128], index: 8, kind: input, shape index: {}]   ;;  %s586_s9 = inlined_call_operand.vmem [shape: f32[1,128], index: 9, kind: input, shape index: {}]   ;;  %s587_s10 = inlined_call_operand.vmem [shape: f32[8,256], index: 10, kind: output, shape index: {}]  }
   0x1   :  { %16 = vsyncpa [#allocation5], 0  ;;  %s41_s15 = sshll.u32 %s581_s4, 4  ;;  %s42_s15 = int_to_ptr.hbm [resolvable:$true] %s41_s15 }
   0x2   :  { %17 = vsyncpa [#allocation8], 0  ;;  %s469_s16 = smov [#allocation4]   ;;  %s26_s20 = sshll.u32 %s579_s2, 4  ;;  %s27_s20 = int_to_ptr.hbm [resolvable:$true] %s26_s20 }
   0x3   :  { %s43_s17 = sshll.u32 %s469_s16, 4  ;;  %s470_s21 = smov 256   ;;  %s44_s17 = int_to_ptr.vmem [resolvable:$true] %s43_s17 }
   0x4   :  { %s471_s22 = smov 16   ;;  %s472_s23 = smov [#allocation2]  }
   0x5   :  { %49 = dma.hbm_to_vmem [thread:$0]  %s42_s15, 4096, %s44_s17, [#allocation5], %s470_s21, %s470_s21, %s471_s22  }
   0x6   :  { %s28_s24 = sshll.u32 %s472_s23, 4  ;;  %s473_s25 = smov 128   ;;  %s29_s24 = int_to_ptr.vmem [resolvable:$true] %s28_s24 }
   0x7   :  { %s474_s26 = smov 8   ;;  %s56_s28 = sshll.u32 %s583_s6, 4  ;;  %s57_s28 = int_to_ptr.hbm [resolvable:$true] %s56_s28 }
   0x8   :  { %34 = dma.hbm_to_vmem [thread:$0]  %s27_s20, 2048, %s29_s24, [#allocation3], %s473_s25, %s473_s25, %s474_s26  }
   0x9   :  { %s475_s29 = smov [#allocation6]   ;;  %s71_s12 = sshll.u32 %s585_s8, 4  ;;  %s72_s12 = int_to_ptr.hbm [resolvable:$true] %s71_s12 }
   0xa   :  { %s58_s30 = sshll.u32 %s475_s29, 4  ;;  %s476_s13 = smov [#allocation7]   ;;  %s59_s30 = int_to_ptr.vmem [resolvable:$true] %s58_s30 }
   0xb   :  { %64 = dma.hbm_to_vmem [thread:$0]  %s57_s28, 2048, %s59_s30, [#allocation5], %s473_s25, %s473_s25, %s474_s26  }
   0xc   :  { %s73_s14 = sshll.u32 %s476_s13, 4  ;;  %s74_s14 = int_to_ptr.vmem [resolvable:$true] %s73_s14 }
   0xd   :  { %79 = dma.hbm_to_vmem [thread:$0]  %s72_s12, 2048, %s74_s14, [#allocation8], %s473_s25, %s473_s25, %s474_s26  }
   0xe   :  { %463 = dma.done.wait [#allocation3], 2048  }
   0xf   :  { %464 = vsyncadd [#allocation3], 4294965248 }
  0x10   :  { %465 = dma.done.wait [#allocation5], 6144  }
  0x11   :  { %466 = vsyncadd [#allocation5], 4294961152 }
  0x12   :  { %467 = dma.done.wait [#allocation8], 2048  }
  0x13   :  { %468 = vsyncadd [#allocation8], 4294965248  ;;  %v114_v0 = vld [vmem:[#allocation2 + $0x78] sm:$0xff]  ;;  %v113_v1 = vld [vmem:[#allocation2 + $0x70] sm:$0xff]  ;;  %s477_s17 = smov 32   ;;  %vm329_vm0 = vcmask 261248  }
  0x14   :  { %119 = vmatpush.msra.mxu0 %v114_v0  ;;  %v112_v2 = vld [vmem:[#allocation2 + $0x68] sm:$0xff]  ;;  %v111_v3 = vld [vmem:[#allocation2 + $0x60] sm:$0xff]  ;;  %v110_v4 = vld [vmem:[#allocation2 + $0x58] sm:$0xff]  ;;  %vm335_vm1 = vcmask 392448  }
  0x15   :  { %v170_v5 = vld [vmem:[#allocation4 + $0xf0] sm:$0xff]  ;;  %v171_v6 = vld [vmem:[#allocation4 + $0xf8] sm:$0xff]  ;;  %v168_v7 = vld [vmem:[#allocation4 + $0xe0] sm:$0xff] }
  0x16   :  { %120 = vmatpush.msra.mxu0 %v113_v1  ;;  %178 = vmatpush.msra.mxu1 %v170_v5  ;;  %v169_v8 = vld [vmem:[#allocation4 + $0xe8] sm:$0xff]  ;;  %v166_v9 = vld [vmem:[#allocation4 + $0xd0] sm:$0xff]  ;;  %v167_v11 = vld [vmem:[#allocation4 + $0xd8] sm:$0xff] }
  0x17   :  { %198 = vmatpush.msra.mxu2 %v171_v6  ;;  %v109_v10 = vld [vmem:[#allocation2 + $0x50] sm:$0xff]  ;;  %v164_v12 = vld [vmem:[#allocation4 + $0xc0] sm:$0xff]  ;;  %v108_v13 = vld [vmem:[#allocation2 + $0x48] sm:$0xff] }
  0x18   :  { %121 = vmatpush.msra.mxu0 %v112_v2  ;;  %179 = vmatpush.msra.mxu1 %v168_v7  ;;  %v165_v14 = vld [vmem:[#allocation4 + $0xc8] sm:$0xff]  ;;  %v162_v15 = vld [vmem:[#allocation4 + $0xb0] sm:$0xff]  ;;  %v107_v16 = vld [vmem:[#allocation2 + $0x40] sm:$0xff] }
  0x19   :  { %199 = vmatpush.msra.mxu2 %v169_v8  ;;  %v163_v17 = vld [vmem:[#allocation4 + $0xb8] sm:$0xff]  ;;  %v160_v18 = vld [vmem:[#allocation4 + $0xa0] sm:$0xff]  ;;  %v161_v20 = vld [vmem:[#allocation4 + $0xa8] sm:$0xff] }
  0x1a   :  { %122 = vmatpush.msra.mxu0 %v111_v3  ;;  %180 = vmatpush.msra.mxu1 %v166_v9  ;;  %v106_v19 = vld [vmem:[#allocation2 + $0x38] sm:$0xff]  ;;  %v158_v21 = vld [vmem:[#allocation4 + $0x90] sm:$0xff]  ;;  %v156_v24 = vld [vmem:[#allocation4 + $0x80] sm:$0xff] }
  0x1b   :  { %200 = vmatpush.msra.mxu2 %v167_v11  ;;  %v105_v22 = vld [vmem:[#allocation2 + $0x30] sm:$0xff]  ;;  %v159_v23 = vld [vmem:[#allocation4 + $0x98] sm:$0xff]  ;;  %v104_v25 = vld [vmem:[#allocation2 + $0x28] sm:$0xff] }
  0x1c   :  { %123 = vmatpush.msra.mxu0 %v110_v4  ;;  %181 = vmatpush.msra.mxu1 %v164_v12  ;;  %v157_v26 = vld [vmem:[#allocation4 + $0x88] sm:$0xff]  ;;  %v154_v27 = vld [vmem:[#allocation4 + $0x70] sm:$0xff]  ;;  %v103_v28 = vld [vmem:[#allocation2 + $0x20] sm:$0xff] }
  0x1d   :  { %201 = vmatpush.msra.mxu2 %v165_v14  ;;  %v155_v29 = vld [vmem:[#allocation4 + $0x78] sm:$0xff]  ;;  %v152_v30 = vld [vmem:[#allocation4 + $0x60] sm:$0xff]  ;;  %v153_v32 = vld [vmem:[#allocation4 + $0x68] sm:$0xff] }
  0x1e   :  { %124 = vmatpush.msra.mxu0 %v109_v10  ;;  %182 = vmatpush.msra.mxu1 %v162_v15  ;;  %v102_v31 = vld [vmem:[#allocation2 + $0x18] sm:$0xff]  ;;  %v150_v33 = vld [vmem:[#allocation4 + $0x50] sm:$0xff]  ;;  %v100_v36 = vld [vmem:[#allocation2 + $0x8] sm:$0xff] }
  0x1f   :  { %202 = vmatpush.msra.mxu2 %v163_v17  ;;  %v101_v34 = vld [vmem:[#allocation2 + $0x10] sm:$0xff]  ;;  %v151_v35 = vld [vmem:[#allocation4 + $0x58] sm:$0xff]  ;;  %v99_v37 = vld [vmem:[#allocation2] sm:$0xff] }
  0x20   :  { %125 = vmatpush.msra.mxu0 %v108_v13  ;;  %183 = vmatpush.msra.mxu1 %v160_v18  ;;  %v98_v38 = vld [vmem:[%s577_s0] sm:$0xff]  ;;  %v149_v40 = vld [vmem:[#allocation4 + $0x48] sm:$0xff]  ;;  %v146_v41 = vld [vmem:[#allocation4 + $0x30] sm:$0xff] }
  0x21   :  { %203 = vmatpush.msra.mxu2 %v161_v20  ;;  %v148_v39 = vld [vmem:[#allocation4 + $0x40] sm:$0xff]  ;;  %v147_v42 = vld [vmem:[#allocation4 + $0x38] sm:$0xff]  ;;  %v145_v44 = vld [vmem:[#allocation4 + $0x28] sm:$0xff] }
  0x22   :  { %126 = vmatpush.msra.mxu0 %v107_v16  ;;  %184 = vmatpush.msra.mxu1 %v158_v21  ;;  %v144_v43 = vld [vmem:[#allocation4 + $0x20] sm:$0xff]  ;;  %v142_v45 = vld [vmem:[#allocation4 + $0x10] sm:$0xff]  ;;  %v143_v46 = vld [vmem:[#allocation4 + $0x18] sm:$0xff] }
  0x23   :  { %204 = vmatpush.msra.mxu2 %v159_v23  ;;  %v140_v47 = vld [vmem:[#allocation4] sm:$0xff]  ;;  %v141_v48 = vld [vmem:[#allocation4 + $0x8] sm:$0xff]  ;;  %v238_v49 = vld [vmem:[#allocation6 + $0x78] sm:$0xff] }
  0x24   :  { %127 = vmatpush.msra.mxu0 %v106_v19  ;;  %185 = vmatpush.msra.mxu1 %v156_v24  ;;  %v237_v50 = vld [vmem:[#allocation6 + $0x70] sm:$0xff]  ;;  %v236_v51 = vld [vmem:[#allocation6 + $0x68] sm:$0xff]  ;;  %v235_v52 = vld [vmem:[#allocation6 + $0x60] sm:$0xff] }
  0x25   :  { %205 = vmatpush.msra.mxu2 %v157_v26  ;;  %243 = vmatpush.msra.mxu3 %v238_v49  ;;  %v234_v53 = vld [vmem:[#allocation6 + $0x58] sm:$0xff]  ;;  %v354_v54 = vld [vmem:[%s580_s3] ss:$0 sm:$0xff]  ;;  %v233_v58 = vld [vmem:[#allocation6 + $0x50] sm:$0xff] }
  0x26   :  { %128 = vmatpush.msra.mxu0 %v105_v22  ;;  %186 = vmatpush.msra.mxu1 %v154_v27  ;;  %v232_v59 = vld [vmem:[#allocation6 + $0x48] sm:$0xff]  ;;  %v231_v60 = vld [vmem:[#allocation6 + $0x40] sm:$0xff]  ;;  %v230_v61 = vld [vmem:[#allocation6 + $0x38] sm:$0xff] }
  0x27   :  { %206 = vmatpush.msra.mxu2 %v155_v29  ;;  %244 = vmatpush.msra.mxu3 %v237_v50  ;;  %v229_v62 = vld [vmem:[#allocation6 + $0x30] sm:$0xff]  ;;  %v228_v63 = vld [vmem:[#allocation6 + $0x28] sm:$0xff]  ;;  %v227_v0 = vld [vmem:[#allocation6 + $0x20] sm:$0xff] }
  0x28   :  { %129 = vmatpush.msra.mxu0 %v104_v25  ;;  %187 = vmatpush.msra.mxu1 %v152_v30  ;;  %v226_v1 = vld [vmem:[#allocation6 + $0x18] sm:$0xff]  ;;  %v225_v2 = vld [vmem:[#allocation6 + $0x10] sm:$0xff]  ;;  %v224_v3 = vld [vmem:[#allocation6 + $0x8] sm:$0xff] }
  0x29   :  { %207 = vmatpush.msra.mxu2 %v153_v32  ;;  %245 = vmatpush.msra.mxu3 %v236_v51  ;;  %v223_v4 = vld [vmem:[#allocation6] sm:$0xff]  ;;  %v279_v17 = vld [vmem:[#allocation7 + $0x78] sm:$0xff]  ;;  %v278_v18 = vld [vmem:[#allocation7 + $0x70] sm:$0xff] }
  0x2a   :  { %130 = vmatpush.msra.mxu0 %v103_v28  ;;  %188 = vmatpush.msra.mxu1 %v150_v33  ;;  %v172_v5 = vld [vmem:[%s582_s5] sm:$0x3]  ;;  %v277_v19 = vld [vmem:[#allocation7 + $0x68] sm:$0xff]  ;;  %v275_v21 = vld [vmem:[#allocation7 + $0x58] sm:$0xff] }
  0x2b   :  { %208 = vmatpush.msra.mxu2 %v151_v35  ;;  %246 = vmatpush.msra.mxu3 %v235_v52  ;;  %v174_v6 = vperm.slane %v172_v5, 0  ;;  %v175_v9 = vperm.slane %v172_v5, 1  ;;  %v220_v13 = vld [vmem:[%s578_s1] sm:$0xff]  ;;  %v274_v22 = vld [vmem:[#allocation7 + $0x50] sm:$0xff]  ;;  %v273_v23 = vld [vmem:[#allocation7 + $0x48] sm:$0xff] }
  0x2c   :  { %131 = vmatpush.msra.mxu0 %v102_v31  ;;  %189 = vmatpush.msra.mxu1 %v148_v39  ;;  %v276_v20 = vld [vmem:[#allocation7 + $0x60] sm:$0xff]  ;;  %v271_v25 = vld [vmem:[#allocation7 + $0x38] sm:$0xff]  ;;  %v270_v26 = vld [vmem:[#allocation7 + $0x30] sm:$0xff] }
  0x2d   :  { %209 = vmatpush.msra.mxu2 %v149_v40  ;;  %247 = vmatpush.msra.mxu3 %v234_v53  ;;  %v272_v24 = vld [vmem:[#allocation7 + $0x40] sm:$0xff]  ;;  %v269_v27 = vld [vmem:[#allocation7 + $0x28] sm:$0xff]  ;;  %v267_v30 = vld [vmem:[#allocation7 + $0x18] sm:$0xff] }
  0x2e   :  { %132 = vmatpush.msra.mxu0 %v101_v34  ;;  %190 = vmatpush.msra.mxu1 %v146_v41  ;;  %v268_v29 = vld [vmem:[#allocation7 + $0x20] sm:$0xff]  ;;  %v266_v31 = vld [vmem:[#allocation7 + $0x10] sm:$0xff]  ;;  %v265_v33 = vld [vmem:[#allocation7 + $0x8] sm:$0xff] }
  0x2f   :  { %210 = vmatpush.msra.mxu2 %v147_v42  ;;  %248 = vmatpush.msra.mxu3 %v233_v58  ;;  %v264_v34 = vld [vmem:[#allocation7] sm:$0xff] }
  0x30   :  { %133 = vmatpush.msra.mxu0 %v100_v36  ;;  %191 = vmatpush.msra.mxu1 %v144_v43  ;;  %v355_v35 = vld [vmem:[%s584_s7] ss:$0 sm:$0xff] }
  0x31   :  { %211 = vmatpush.msra.mxu2 %v145_v44  ;;  %249 = vmatpush.msra.mxu3 %v232_v59  ;;  %v356_v39 = vld [vmem:[%s586_s9] ss:$0 sm:$0xff] }
  0x32   :  { %134 = vmatpush.msra.mxu0 %v99_v37  ;;  %192 = vmatpush.msra.mxu1 %v142_v45 }
  0x33   :  { %135 = vmatmul.f32.vlgmr.msra.gmra.mxu0 %v98_v38  ;;  %212 = vmatpush.msra.mxu2 %v143_v46 }
  0x34   :  { %193 = vmatpush.msra.mxu1 %v140_v47  ;;  %250 = vmatpush.msra.mxu3 %v231_v60 }
  0x35   :  { %213 = vmatpush.msra.mxu2 %v141_v48  ;;  %284 = vmatpush.msrb.mxu0 %v279_v17 }
  0x36   :  { %251 = vmatpush.msra.mxu3 %v230_v61 }
  0x37   :  { %285 = vmatpush.msrb.mxu0 %v278_v18 }
  0x38   :  { %252 = vmatpush.msra.mxu3 %v229_v62 }
  0x39   :  { %286 = vmatpush.msrb.mxu0 %v277_v19 }
  0x3a   :  { %253 = vmatpush.msra.mxu3 %v228_v63 }
  0x3b   :  { %287 = vmatpush.msrb.mxu0 %v276_v20 }
  0x3c   :  { %254 = vmatpush.msra.mxu3 %v227_v0 }
  0x3d   :  { %288 = vmatpush.msrb.mxu0 %v275_v21 }
  0x3e   :  { %255 = vmatpush.msra.mxu3 %v226_v1 }
  0x3f   :  { %289 = vmatpush.msrb.mxu0 %v274_v22 }
  0x40   :  { %256 = vmatpush.msra.mxu3 %v225_v2 }
  0x41   :  { %290 = vmatpush.msrb.mxu0 %v273_v23 }
  0x42   :  { %257 = vmatpush.msra.mxu3 %v224_v3 }
  0x43   :  { %291 = vmatpush.msrb.mxu0 %v272_v24 }
  0x44   :  { %258 = vmatpush.msra.mxu3 %v223_v4 }
  0x45   :  { %292 = vmatpush.msrb.mxu0 %v271_v25 }
  0x47   :  { %293 = vmatpush.msrb.mxu0 %v270_v26 }
  0x49   :  { %294 = vmatpush.msrb.mxu0 %v269_v27 }
  0x4b   :  { %295 = vmatpush.msrb.mxu0 %v268_v29 }
  0x4d   :  { %296 = vmatpush.msrb.mxu0 %v267_v30 }
  0x4f   :  { %297 = vmatpush.msrb.mxu0 %v266_v31 }
  0x51   :  { %298 = vmatpush.msrb.mxu0 %v265_v33 }
  0x53   :  { %299 = vmatpush.msrb.mxu0 %v264_v34 }
  0xb0   :  { %v136_v55 = vpop.f32.mrf.mxu0 }
  0xb1   :  { %v137_v56 = vadd.f32 %v354_v54, %v136_v55 }
  0xb3   :  { %357 = vtanh.f32 %v137_v56 }
  0xb9   :  { %v358_v57 = vpop.eup %357 }
  0xba   :  { %194 = vmatmul.f32.vlgmr.msra.gmra.mxu1 %v358_v57  ;;  %214 = vmatmul.f32.vlgmr.msra.gmra.mxu2 %v358_v57 }
 0x137   :  { %v195_v7 = vpop.f32.mrf.mxu1 }
 0x138   :  { %v196_v8 = vadd.f32 %v195_v7, %v174_v6 }
 0x13a   :  { %326 = vrot.lane.b32.xlu0 %v196_v8, %s471_s22 }
 0x13d   :  { %v215_v10 = vpop.f32.mrf.mxu2 }
 0x13e   :  { %v216_v11 = vadd.f32 %v215_v10, %v175_v9 }
 0x140   :  { %v218_v12 = vmul.f32 1.442695, %v216_v11 }
 0x142   :  { %359 = vpow2.f32 %v218_v12  ;;  %332 = vrot.lane.b32.xlu0 %v216_v11, %s477_s17 }
 0x148   :  { %v360_v14 = vpop.eup %359 }
 0x149   :  { %v221_v15 = vmul.f32 %v360_v14, %v220_v13 }
 0x14b   :  { %v222_v16 = vadd.f32 %v221_v15, %v196_v8 }
 0x14d   :  { %259 = vmatmul.f32.vlgmr.msra.gmra.mxu3 %v222_v16  ;;  %324 = vst [vmem:[%s587_s10 + $0x8] sm:$0xff] %v222_v16 }
 0x1ac   :  { %v327_v28 = vpop.permute.xlu0 %326 }
 0x1ad   :  { %330 = vst.msk [vmem:[%s587_s10 + $0x8] sm:$0xff] %vm329_vm0, %v327_v28 }
 0x1b4   :  { %v333_v32 = vpop.permute.xlu0 %332 }
 0x1b5   :  { %336 = vst.msk [vmem:[%s587_s10 + $0x8] sm:$0xff] %vm335_vm1, %v333_v32 }
 0x1d0   :  { %v260_v36 = vpop.f32.mrf.mxu3 }
 0x1d1   :  { %v261_v37 = vadd.f32 %v355_v35, %v260_v36 }
 0x1d3   :  { %361 = vtanh.f32 %v261_v37 }
 0x1d9   :  { %v362_v38 = vpop.eup %361 }
 0x1da   :  { %300 = vmatmul.f32.vlgmr.msrb.gmra.mxu0 %v362_v38 }
 0x257   :  { %v301_v40 = vpop.f32.mrf.mxu0 }
 0x258   :  { %v302_v41 = vadd.f32 %v356_v39, %v301_v40 }
 0x25a   :  { %v344_v42 = vmul.f32 -1.442695, %v302_v41 }
 0x25c   :  { %363 = vpow2.f32 %v344_v42 }
 0x262   :  { %v364_v43 = vpop.eup %363 }
 0x263   :  { %v307_v44 = vadd.f32 1.0, %v364_v43 }
 0x265   :  { %365 = vrcp.f32 %v307_v44  ;;  %v319_v48 = vand.u32 2147483648, %v307_v44  ;;  %v317_v50 = vand.u32 2147483647, %v307_v44  ;;  %vm313_vm3 = vweird.f32 %v307_v44 }
 0x267   :  { %v320_v52 = vor.u32 1.1754944e-38, %v319_v48  ;;  %vm318_vm5 = vcmp.eq.f32.partialorder %v317_v50, 8.507059e+37 }
 0x26b   :  { %v366_v45 = vpop.eup %365 }
 0x26c   :  { %v309_v46 = vmul.f32 %v366_v45, %v307_v44  ;;  %vm314_vm2 = vweird.f32 %v366_v45 }
 0x26d   :  { %vm315_vm4 = vmor %vm313_vm3, %vm314_vm2 }
 0x26e   :  { %v310_v47 = vsub.f32 1.0, %v309_v46 }
 0x270   :  { %v311_v49 = vmul.f32 %v366_v45, %v310_v47 }
 0x272   :  { %v312_v51 = vadd.f32 %v366_v45, %v311_v49 }
 0x274   :  { %v316_v53 = vsel %vm315_vm4, %v366_v45, %v312_v51 }
 0x275   :  { %v321_v54 = vsel %vm318_vm5, %v320_v52, %v316_v53 }
 0x276   :  { %323 = vst [vmem:[%s587_s10] sm:$0xff] %v321_v54 }
 0x277   :  { %341 = vsyncpa [#allocation3], 1 }
 0x278   :  { %342 = vsyncpa [#allocation5], 1 }
 0x279   :  { %343 = vsyncpa [#allocation8], 1 }

</bundles_post_ra>
